<compile_context>
chip_gen: v6e
topology: v6e:2x2x1
jax: 0.10.0
libtpu: 0.0.40
codegen_flags: <defaults>
</compile_context>

<pallas_src>
import jax
import jax.numpy as jnp
from jax.experimental import pallas as pl
from jax.experimental.pallas import tpu as pltpu


def _round_up(x, m):
    return ((x + m - 1) // m) * m


# --------------------------- fused kernel ------------------------------------------
def fused_mix_kernel(states_i_ref, states_t_ref, lq_t_ref,
                     w2a_ref, b2a_ref, w2b_ref, b2b_ref,
                     w1at_ref, b1at_ref, w1bt_ref, b1bt_ref,
                     out_ref):
    # ---- hyper_w2 branch (row-major, this (tm, S) row tile) -> s2: (tm, 1)
    h2 = jnp.dot(states_i_ref[...], w2a_ref[...],
                 preferred_element_type=jnp.float32) + b2a_ref[...]
    h2 = jnp.maximum(h2, 0.0).astype(w2b_ref.dtype)
    w2h = jnp.abs(jnp.dot(h2, w2b_ref[...],
                          preferred_element_type=jnp.float32) + b2b_ref[...])
    s2 = jnp.sum(w2h, axis=1, keepdims=True)                        # (tm, 1) f32

    # ---- hyper_w1 branch (batch on lanes, full padded batch) -> dot_row: (1, BC)
    # Recomputed per row tile so the grid axis can stay "parallel" (v7x 2 TCs);
    # the matmul work here is tiny relative to the (tm, BC) output write.
    h1t = jnp.dot(w1at_ref[...], states_t_ref[...],
                  preferred_element_type=jnp.float32) + b1at_ref[...]
    h1t = jnp.maximum(h1t, 0.0).astype(w1bt_ref.dtype)
    w1ht = jnp.abs(jnp.dot(w1bt_ref[...], h1t,
                           preferred_element_type=jnp.float32) + b1bt_ref[...])
    dot_row = jnp.sum(w1ht * lq_t_ref[...], axis=0, keepdims=True)  # (1, BC) f32

    # out[i, j] = s2[i] + dot[j]   (lane-dense (tm, BC) store)
    out_ref[...] = (s2 + dot_row).astype(out_ref.dtype)


# --------------------------- parameters --------------------------------------------
def init_params(key, state_dim, num_agents, hidden=128):
    """Weights stored (in, out): forward is x @ W + b."""
    ks = jax.random.split(key, 8)

    def lin(kw, kb, fan_in, fan_out):
        bound = 1.0 / jnp.sqrt(fan_in)
        W = jax.random.uniform(kw, (fan_in, fan_out), jnp.float32, -bound, bound)
        b = jax.random.uniform(kb, (1, fan_out), jnp.float32, -bound, bound)
        return W, b

    w1a, b1a = lin(ks[0], ks[1], state_dim, hidden)
    w1b, b1b = lin(ks[2], ks[3], hidden, num_agents)
    w2a, b2a = lin(ks[4], ks[5], state_dim, hidden)
    w2b, b2b = lin(ks[6], ks[7], hidden, num_agents)
    return (w1a, b1a, w1b, b1b, w2a, b2a, w2b, b2b)


def params_from_torch_layout(torch_params):
    """torch nn.Linear stores weight as (out, in); this kernel expects (in, out)."""
    w1a, b1a, w1b, b1b, w2a, b2a, w2b, b2b = torch_params
    t = lambda w: jnp.asarray(w, jnp.float32).T
    r = lambda b: jnp.asarray(b, jnp.float32).reshape(1, -1)
    return (t(w1a), r(b1a), t(w1b), r(b1b), t(w2a), r(b2a), t(w2b), r(b2b))


# --------------------------- wrapper ------------------------------------------------
def mixing_network(states, local_qs, params, *, compute_dtype=jnp.bfloat16, trim=True):
    # Flatten 3-D local_qs exactly like torch's .view(B, -1).
    if local_qs.ndim == 3:
        local_qs = local_qs.reshape(local_qs.shape[0], -1)
    states = states.astype(jnp.float32)
    local_qs = local_qs.astype(jnp.float32)

    B, S = states.shape
    A = local_qs.shape[1]
    H = params[0].shape[1]                        # hidden width (128)

    AP = _round_up(max(A, 1), 128)                # agent lanes (zero-padded, |0|=0)
    BC = _round_up(B, 128)                        # output columns (lane-dense)

    # Row tiling: minimal sublane padding; >=2 "parallel" tiles when B >= 16 so
    # both v7x TensorCores are used; bounded tile bytes at larger B.
    row_bytes = BC * 4
    if B * row_bytes <= (4 << 20):
        tm = _round_up(B, 16) // 2 if B >= 16 else _round_up(B, 8)
    else:
        tm = max(8, min(512, (((2 << 20) // row_bytes) // 8) * 8))
    BR = _round_up(B, tm)
    n_row_tiles = BR // tm

    w1a, b1a, w1b, b1b, w2a, b2a, w2b, b2b = params
    cd = compute_dtype
    pad_a = AP - A

    # hyper_w2 branch weights (row-major): x @ W + b, agents zero-padded to AP.
    w2a_c = w2a.astype(cd)                                              # (S, H)
    b2a_c = b2a.astype(jnp.float32)                                     # (1, H)
    w2b_c = jnp.pad(w2b, ((0, 0), (0, pad_a))).astype(cd)               # (H, AP)
    b2b_c = jnp.pad(b2b, ((0, 0), (0, pad_a))).astype(jnp.float32)      # (1, AP)

    # hyper_w1 branch weights, pre-transposed so the batch lives on lanes.
    w1at = w1a.T.astype(cd)                                             # (H, S)
    b1at = b1a.T.astype(jnp.float32)                                    # (H, 1)
    w1bt = jnp.pad(w1b, ((0, 0), (0, pad_a))).T.astype(cd)              # (AP, H)
    b1bt = jnp.pad(b1b, ((0, 0), (0, pad_a))).T.astype(jnp.float32)     # (AP, 1)

    states_rows = jnp.pad(states, ((0, BR - B), (0, 0))).astype(cd)     # (BR, S)
    states_t = jnp.pad(states, ((0, BC - B), (0, 0))).T.astype(cd)      # (S, BC)
    lq_t = jnp.pad(local_qs, ((0, BC - B), (0, pad_a))).T               # (AP, BC) f32

    flops = int(2 * (n_row_tiles * BC + BR) * (S * H + H * AP)
                + 4 * n_row_tiles * BC * AP + BR * BC)
    bytes_accessed = int(
        states_rows.size * states_rows.dtype.itemsize
        + states_t.size * states_t.dtype.itemsize
        + lq_t.size * lq_t.dtype.itemsize
        + sum(a.size * a.dtype.itemsize
              for a in (w2a_c, b2a_c, w2b_c, b2b_c, w1at, b1at, w1bt, b1bt))
        + BR * BC * 4)

    out_padded = pl.pallas_call(
        fused_mix_kernel,
        out_shape=jax.ShapeDtypeStruct((BR, BC), jnp.float32),
        grid=(n_row_tiles,),
        in_specs=[
            pl.BlockSpec((tm, S), lambda i: (i, 0)),     # states rows (streamed)
            pl.BlockSpec((S, BC), lambda i: (0, 0)),     # states^T   (resident)
            pl.BlockSpec((AP, BC), lambda i: (0, 0)),    # local_qs^T (resident)
            pl.BlockSpec((S, H), lambda i: (0, 0)),      # w2a
            pl.BlockSpec((1, H), lambda i: (0, 0)),      # b2a
            pl.BlockSpec((H, AP), lambda i: (0, 0)),     # w2b
            pl.BlockSpec((1, AP), lambda i: (0, 0)),     # b2b
            pl.BlockSpec((H, S), lambda i: (0, 0)),      # w1a^T
            pl.BlockSpec((H, 1), lambda i: (0, 0)),      # b1a^T
            pl.BlockSpec((AP, H), lambda i: (0, 0)),     # w1b^T
            pl.BlockSpec((AP, 1), lambda i: (0, 0)),     # b1b^T
        ],
        out_specs=pl.BlockSpec((tm, BC), lambda i: (i, 0)),
        compiler_params=pltpu.CompilerParams(
            dimension_semantics=("parallel",),
            vmem_limit_bytes=32 * 1024 * 1024),
        cost_estimate=pl.CostEstimate(flops=flops, transcendentals=0,
                                      bytes_accessed=bytes_accessed),
    )(states_rows, states_t, lq_t,
      w2a_c, b2a_c, w2b_c, b2b_c, w1at, b1at, w1bt, b1bt)

    if not trim:
        # NOTE: padded rows/cols are NOT zero (they carry bias-driven garbage);
        # a consumer using trim=False must ignore rows/cols >= B.
        return out_padded
    return out_padded[:B, :B]


# --------------------------- pure-JAX reference -------------------------------------
def mixing_network_ref(states, local_qs, params, compute_dtype=jnp.float32):
    """Mirrors the torch forward; compute_dtype controls the matmul operand dtype."""
    if local_qs.ndim == 3:
        local_qs = local_qs.reshape(local_qs.shape[0], -1)
    w1a, b1a, w1b, b1b, w2a, b2a, w2b, b2b = params
    cd = compute_dtype
    x = states.astype(cd)

    def branch(wa, ba, wb, bb):
        h = jnp.dot(x, wa.astype(cd), preferred_element_type=jnp.float32) + ba
        h = jnp.maximum(h, 0.0).astype(cd)
        return jnp.abs(jnp.dot(h, wb.astype(cd),
                               preferred_element_type=jnp.float32) + bb)

    w1 = branch(w1a, b1a, w1b, b1b)
    w2 = branch(w2a, b2a, w2b, b2b)
    dot = jnp.einsum('bq,bq->b', w1, local_qs.astype(jnp.float32))   # (B,)
    s2 = jnp.sum(w2, axis=1, keepdims=True)                          # (B, 1)
    return dot[None, :] + s2           # torch (B,) + (B,1) broadcast -> (B, B)


if __name__ == "__main__":
    B, STATE_DIM, NUM_AGENTS = 8, 32, 4

    key = jax.random.PRNGKey(0)
    kp, ks, kq = jax.random.split(key, 3)

    params = init_params(kp, STATE_DIM, NUM_AGENTS)
    states = jax.random.normal(ks, (B, STATE_DIM), jnp.float32)
    local_qs = jax.random.normal(kq, (B, NUM_AGENTS, 1), jnp.float32)   # 3-D path

    out = mixing_network(states, local_qs, params)       # bf16 MXU operands, f32 acc
    out = jax.block_until_ready(out)
    assert out.shape == (B, B)

    # Structural check against a reference that mirrors the bf16 operand casts.
    ref_bf16 = mixing_network_ref(states, local_qs, params, compute_dtype=jnp.bfloat16)
    err_b = float(jnp.max(jnp.abs(out - ref_bf16)))
    assert jnp.allclose(out, ref_bf16, atol=2e-2, rtol=2e-2), (
        f"mismatch vs bf16 reference, max abs err={err_b}")

    # Semantic check against the full-f32 torch-equivalent forward (tolerance
    # relaxed because the kernel feeds bf16 operands to the MXU, per perf review).
    ref_f32 = mixing_network_ref(states, local_qs, params, compute_dtype=jnp.float32)
    err_f = float(jnp.max(jnp.abs(out - ref_f32)))
    assert jnp.allclose(out, ref_f32, atol=1.5e-1, rtol=1e-1), (
        f"mismatch vs f32 reference, max abs err={err_f}")

    print("KERNEL_OK")
</pallas_src>

<mosaic_0001>
module attributes {stable_mosaic.version = 11 : i64} {
  func.func @fused_mix_kernel(%arg0: i32, %arg1: memref<8x32xbf16, #tpu.memory_space<vmem>>, %arg2: memref<32x128xbf16, #tpu.memory_space<vmem>>, %arg3: memref<128x128xf32, #tpu.memory_space<vmem>>, %arg4: memref<32x128xbf16, #tpu.memory_space<vmem>>, %arg5: memref<1x128xf32, #tpu.memory_space<vmem>>, %arg6: memref<128x128xbf16, #tpu.memory_space<vmem>>, %arg7: memref<1x128xf32, #tpu.memory_space<vmem>>, %arg8: memref<128x32xbf16, #tpu.memory_space<vmem>>, %arg9: memref<128x1xf32, #tpu.memory_space<vmem>>, %arg10: memref<128x128xbf16, #tpu.memory_space<vmem>>, %arg11: memref<128x1xf32, #tpu.memory_space<vmem>>, %arg12: memref<8x128xf32, #tpu.memory_space<vmem>>) attributes {dimension_semantics = [#tpu.dimension_semantics<parallel>], iteration_bounds = array<i64: 1>, scalar_prefetch = 0 : i64, scratch_operands = 0 : i64, tpu.core_type = #tpu.core_type<tc>, window_params = [{transform_indices = @transform_0, window_bounds = array<i64: 8, 32>}, {pipeline_mode = #tpu.pipeline_mode<synchronous>, transform_indices = @transform_1, window_bounds = array<i64: 32, 128>}, {pipeline_mode = #tpu.pipeline_mode<synchronous>, transform_indices = @transform_2, window_bounds = array<i64: 128, 128>}, {pipeline_mode = #tpu.pipeline_mode<synchronous>, transform_indices = @transform_3, window_bounds = array<i64: 32, 128>}, {pipeline_mode = #tpu.pipeline_mode<synchronous>, transform_indices = @transform_4, window_bounds = array<i64: 1, 128>}, {pipeline_mode = #tpu.pipeline_mode<synchronous>, transform_indices = @transform_5, window_bounds = array<i64: 128, 128>}, {pipeline_mode = #tpu.pipeline_mode<synchronous>, transform_indices = @transform_6, window_bounds = array<i64: 1, 128>}, {pipeline_mode = #tpu.pipeline_mode<synchronous>, transform_indices = @transform_7, window_bounds = array<i64: 128, 32>}, {pipeline_mode = #tpu.pipeline_mode<synchronous>, transform_indices = @transform_8, window_bounds = array<i64: 128, 1>}, {pipeline_mode = #tpu.pipeline_mode<synchronous>, transform_indices = @transform_9, window_bounds = array<i64: 128, 128>}, {pipeline_mode = #tpu.pipeline_mode<synchronous>, transform_indices = @transform_10, window_bounds = array<i64: 128, 1>}, {transform_indices = @transform_11, window_bounds = array<i64: 8, 128>}]} {
    %c0 = arith.constant 0 : index
    %c0_0 = arith.constant 0 : index
    %0 = vector.load %arg1[%c0, %c0_0] : memref<8x32xbf16, #tpu.memory_space<vmem>>, vector<8x32xbf16>
    %c0_1 = arith.constant 0 : index
    %c0_2 = arith.constant 0 : index
    %1 = vector.load %arg4[%c0_1, %c0_2] : memref<32x128xbf16, #tpu.memory_space<vmem>>, vector<32x128xbf16>
    %cst = arith.constant dense<0.000000e+00> : vector<8x128xf32>
    %2 = tpu.matmul %0, %1, %cst {dimension_numbers = #tpu.dot_dimension_numbers<[1], [0], [0], [1], [0, 0, 1, 1], [], []>} : vector<8x32xbf16>, vector<32x128xbf16>, vector<8x128xf32> -> vector<8x128xf32>
    %c0_3 = arith.constant 0 : index
    %c0_4 = arith.constant 0 : index
    %3 = vector.load %arg5[%c0_3, %c0_4] : memref<1x128xf32, #tpu.memory_space<vmem>>, vector<1x128xf32>
    %4 = vector.broadcast %3 : vector<1x128xf32> to vector<8x128xf32>
    %5 = arith.addf %2, %4 : vector<8x128xf32>
    %cst_5 = arith.constant 0.000000e+00 : f32
    %6 = vector.broadcast %cst_5 : f32 to vector<8x128xf32>
    %7 = arith.maximumf %5, %6 : vector<8x128xf32>
    %8 = arith.truncf %7 : vector<8x128xf32> to vector<8x128xbf16>
    %c0_6 = arith.constant 0 : index
    %c0_7 = arith.constant 0 : index
    %9 = vector.load %arg6[%c0_6, %c0_7] : memref<128x128xbf16, #tpu.memory_space<vmem>>, vector<128x128xbf16>
    %cst_8 = arith.constant dense<0.000000e+00> : vector<8x128xf32>
    %10 = tpu.matmul %8, %9, %cst_8 {dimension_numbers = #tpu.dot_dimension_numbers<[1], [0], [0], [1], [0, 0, 1, 1], [], []>} : vector<8x128xbf16>, vector<128x128xbf16>, vector<8x128xf32> -> vector<8x128xf32>
    %c0_9 = arith.constant 0 : index
    %c0_10 = arith.constant 0 : index
    %11 = vector.load %arg7[%c0_9, %c0_10] : memref<1x128xf32, #tpu.memory_space<vmem>>, vector<1x128xf32>
    %12 = vector.broadcast %11 : vector<1x128xf32> to vector<8x128xf32>
    %13 = arith.addf %10, %12 : vector<8x128xf32>
    %14 = math.absf %13 : vector<8x128xf32>
    %cst_11 = arith.constant dense<0.000000e+00> : vector<8xf32>
    %15 = vector.multi_reduction <add>, %14, %cst_11 [1] : vector<8x128xf32> to vector<8xf32>
    %16 = vector.shape_cast %15 : vector<8xf32> to vector<8x1xf32>
    %c0_12 = arith.constant 0 : index
    %c0_13 = arith.constant 0 : index
    %17 = vector.load %arg8[%c0_12, %c0_13] : memref<128x32xbf16, #tpu.memory_space<vmem>>, vector<128x32xbf16>
    %c0_14 = arith.constant 0 : index
    %c0_15 = arith.constant 0 : index
    %18 = vector.load %arg2[%c0_14, %c0_15] : memref<32x128xbf16, #tpu.memory_space<vmem>>, vector<32x128xbf16>
    %cst_16 = arith.constant dense<0.000000e+00> : vector<128x128xf32>
    %19 = tpu.matmul %17, %18, %cst_16 {dimension_numbers = #tpu.dot_dimension_numbers<[1], [0], [0], [1], [0, 0, 1, 1], [], []>} : vector<128x32xbf16>, vector<32x128xbf16>, vector<128x128xf32> -> vector<128x128xf32>
    %c0_17 = arith.constant 0 : index
    %c0_18 = arith.constant 0 : index
    %20 = vector.load %arg9[%c0_17, %c0_18] : memref<128x1xf32, #tpu.memory_space<vmem>>, vector<128x1xf32>
    %21 = vector.broadcast %20 : vector<128x1xf32> to vector<128x128xf32>
    %22 = arith.addf %19, %21 : vector<128x128xf32>
    %cst_19 = arith.constant 0.000000e+00 : f32
    %23 = vector.broadcast %cst_19 : f32 to vector<128x128xf32>
    %24 = arith.maximumf %22, %23 : vector<128x128xf32>
    %25 = arith.truncf %24 : vector<128x128xf32> to vector<128x128xbf16>
    %c0_20 = arith.constant 0 : index
    %c0_21 = arith.constant 0 : index
    %26 = vector.load %arg10[%c0_20, %c0_21] : memref<128x128xbf16, #tpu.memory_space<vmem>>, vector<128x128xbf16>
    %cst_22 = arith.constant dense<0.000000e+00> : vector<128x128xf32>
    %27 = tpu.matmul %26, %25, %cst_22 {dimension_numbers = #tpu.dot_dimension_numbers<[1], [0], [0], [1], [0, 0, 1, 1], [], []>} : vector<128x128xbf16>, vector<128x128xbf16>, vector<128x128xf32> -> vector<128x128xf32>
    %c0_23 = arith.constant 0 : index
    %c0_24 = arith.constant 0 : index
    %28 = vector.load %arg11[%c0_23, %c0_24] : memref<128x1xf32, #tpu.memory_space<vmem>>, vector<128x1xf32>
    %29 = vector.broadcast %28 : vector<128x1xf32> to vector<128x128xf32>
    %30 = arith.addf %27, %29 : vector<128x128xf32>
    %31 = math.absf %30 : vector<128x128xf32>
    %c0_25 = arith.constant 0 : index
    %c0_26 = arith.constant 0 : index
    %32 = vector.load %arg3[%c0_25, %c0_26] : memref<128x128xf32, #tpu.memory_space<vmem>>, vector<128x128xf32>
    %33 = arith.mulf %31, %32 : vector<128x128xf32>
    %cst_27 = arith.constant dense<0.000000e+00> : vector<128xf32>
    %34 = vector.multi_reduction <add>, %33, %cst_27 [0] : vector<128x128xf32> to vector<128xf32>
    %35 = vector.shape_cast %34 : vector<128xf32> to vector<1x128xf32>
    %36 = vector.broadcast %16 : vector<8x1xf32> to vector<8x128xf32>
    %37 = vector.broadcast %35 : vector<1x128xf32> to vector<8x128xf32>
    %38 = arith.addf %36, %37 : vector<8x128xf32>
    %c0_28 = arith.constant 0 : index
    %c0_29 = arith.constant 0 : index
    %39 = vector.load %arg12[%c0_28, %c0_29] : memref<8x128xf32, #tpu.memory_space<vmem>>, vector<8x128xf32>
    tpu.vector_store %arg12[%c0_28, %c0_29], %38 {strides = array<i32>} : memref<8x128xf32, #tpu.memory_space<vmem>>, vector<8x128xf32>,
    return
  }
  func.func @transform_0(%arg0: i32) -> (i32, i32) {
    %c0_i32 = arith.constant 0 : i32
    %c0_i32_0 = arith.constant 0 : i32
    return %arg0, %c0_i32 : i32, i32
  }
  func.func @transform_1(%arg0: i32) -> (i32, i32) {
    %c0_i32 = arith.constant 0 : i32
    %c0_i32_0 = arith.constant 0 : i32
    %c0_i32_1 = arith.constant 0 : i32
    return %c0_i32, %c0_i32_0 : i32, i32
  }
  func.func @transform_2(%arg0: i32) -> (i32, i32) {
    %c0_i32 = arith.constant 0 : i32
    %c0_i32_0 = arith.constant 0 : i32
    %c0_i32_1 = arith.constant 0 : i32
    return %c0_i32, %c0_i32_0 : i32, i32
  }
  func.func @transform_3(%arg0: i32) -> (i32, i32) {
    %c0_i32 = arith.constant 0 : i32
    %c0_i32_0 = arith.constant 0 : i32
    %c0_i32_1 = arith.constant 0 : i32
    return %c0_i32, %c0_i32_0 : i32, i32
  }
  func.func @transform_4(%arg0: i32) -> (i32, i32) {
    %c0_i32 = arith.constant 0 : i32
    %c0_i32_0 = arith.constant 0 : i32
    %c0_i32_1 = arith.constant 0 : i32
    return %c0_i32, %c0_i32_0 : i32, i32
  }
  func.func @transform_5(%arg0: i32) -> (i32, i32) {
    %c0_i32 = arith.constant 0 : i32
    %c0_i32_0 = arith.constant 0 : i32
    %c0_i32_1 = arith.constant 0 : i32
    return %c0_i32, %c0_i32_0 : i32, i32
  }
  func.func @transform_6(%arg0: i32) -> (i32, i32) {
    %c0_i32 = arith.constant 0 : i32
    %c0_i32_0 = arith.constant 0 : i32
    %c0_i32_1 = arith.constant 0 : i32
    return %c0_i32, %c0_i32_0 : i32, i32
  }
  func.func @transform_7(%arg0: i32) -> (i32, i32) {
    %c0_i32 = arith.constant 0 : i32
    %c0_i32_0 = arith.constant 0 : i32
    %c0_i32_1 = arith.constant 0 : i32
    return %c0_i32, %c0_i32_0 : i32, i32
  }
  func.func @transform_8(%arg0: i32) -> (i32, i32) {
    %c0_i32 = arith.constant 0 : i32
    %c0_i32_0 = arith.constant 0 : i32
    %c0_i32_1 = arith.constant 0 : i32
    return %c0_i32, %c0_i32_0 : i32, i32
  }
  func.func @transform_9(%arg0: i32) -> (i32, i32) {
    %c0_i32 = arith.constant 0 : i32
    %c0_i32_0 = arith.constant 0 : i32
    %c0_i32_1 = arith.constant 0 : i32
    return %c0_i32, %c0_i32_0 : i32, i32
  }
  func.func @transform_10(%arg0: i32) -> (i32, i32) {
    %c0_i32 = arith.constant 0 : i32
    %c0_i32_0 = arith.constant 0 : i32
    %c0_i32_1 = arith.constant 0 : i32
    return %c0_i32, %c0_i32_0 : i32, i32
  }
  func.func @transform_11(%arg0: i32) -> (i32, i32) {
    %c0_i32 = arith.constant 0 : i32
    %c0_i32_0 = arith.constant 0 : i32
    return %arg0, %c0_i32 : i32, i32
  }
}

</mosaic_0001>

<bundles_post_ra>
// kernel: tpu_custom_call.1
= control target key start
LH: loop header
LB: loop body
LE: loop exit
PB: predicated region body
PF: predicated region fallthrough
CT: control target
= control target key end

     0   :  { %v1092_v1 = vmov 0.0   ;;  %vm1093_vm0 = vmmov 0   ;;  %vm64_vm1 = vcmask 261120   ;;  %v1094_v5 = vmov 0   ;;  %s1431_s0 = inlined_call_operand.vmem [shape: bf16[8,32], index: 0, kind: input, shape index: {}]   ;;  %s1432_s1 = inlined_call_operand.vmem [shape: bf16[32,128], index: 1, kind: input, shape index: {}]   ;;  %s1433_s2 = inlined_call_operand.vmem [shape: f32[128,128], index: 2, kind: input, shape index: {}]   ;;  %s1434_s3 = inlined_call_operand.vmem [shape: bf16[32,128], index: 3, kind: input, shape index: {}]   ;;  %s1435_s4 = inlined_call_operand.vmem [shape: f32[1,128], index: 4, kind: input, shape index: {}]   ;;  %s1436_s5 = inlined_call_operand.vmem [shape: bf16[128,128], index: 5, kind: input, shape index: {}]   ;;  %s1437_s6 = inlined_call_operand.vmem [shape: f32[1,128], index: 6, kind: input, shape index: {}]   ;;  %s1438_s7 = inlined_call_operand.vmem [shape: bf16[128,32], index: 7, kind: input, shape index: {}]   ;;  %s1439_s8 = inlined_call_operand.vmem [shape: f32[128,1], index: 8, kind: input, shape index: {}]   ;;  %s1440_s9 = inlined_call_operand.vmem [shape: bf16[128,128], index: 9, kind: input, shape index: {}]   ;;  %s1441_s10 = inlined_call_operand.vmem [shape: f32[128,1], index: 10, kind: input, shape index: {}]   ;;  %s1442_s11 = inlined_call_operand.hbm [shape: f32[8,128], index: 11, kind: output, shape index: {}]  }
   0x1   :  { %v1042_v0 = vld [vmem:[%s1434_s3 + $0x8] sm:$0xff]   ;;  %956 = vmatprep.subr.bf16.mxu1 %v1092_v1  ;;  %v1044_v3 = vld [vmem:[%s1434_s3] sm:$0xff]   ;;  %960 = vmatprep.mubr.msk.bf16.mxu1 %vm1093_vm0, %v1092_v1  ;;  %v1048_v9 = vld [vmem:[%s1438_s7 + $0x10] sm:$0xff]  }
   0x2   :  { %v1043_v2 = vld [vmem:[%s1432_s1 + $0x8] sm:$0xff]   ;;  %957 = vmatpush3.bf16.msra.mxu1 %v1042_v0  ;;  %v1045_v4 = vld [vmem:[%s1432_s1] sm:$0xff]   ;;  %1040 = vset.pattern.permute.xlu0 %v1094_v5  ;;  %v258_v10 = vld [vmem:[%s1439_s8 + $0x70] sm:$0xff] }
   0x3   :  { %984 = vmatprep.subr.bf16.mxu0 %v1043_v2  ;;  %958 = vmatprep.subr.bf16.mxu1 %v1092_v1  ;;  %v1046_v6 = vld [vmem:[%s1438_s7] sm:$0xff]   ;;  %v1047_v8 = vld [vmem:[%s1438_s7 + $0x8] sm:$0xff]   ;;  %v259_v12 = vld [vmem:[%s1439_s8 + $0x78] sm:$0xff] }
   0x4   :  { %985 = vmatpush3.bf16.msra.mxu0 %v1043_v2  ;;  %1041 = vset.pattern.permute.xlu1 %v1094_v5  ;;  %v40_v7 = vld [vmem:[%s1431_s0] sm:$0xf]  ;;  %v1049_v13 = vld [vmem:[%s1438_s7 + $0x18] sm:$0xff]   ;;  %v257_v14 = vld [vmem:[%s1439_s8 + $0x68] sm:$0xff] }
   0x5   :  { %986 = vmatprep.subr.bf16.mxu0 %v1045_v4  ;;  %988 = vmatprep.mubr.msk.bf16.mxu0 %vm64_vm1, %v1046_v6  ;;  %v256_v11 = vld [vmem:[%s1439_s8 + $0x60] sm:$0xff]  ;;  %v254_v16 = vld [vmem:[%s1439_s8 + $0x50] sm:$0xff]  ;;  %v255_v17 = vld [vmem:[%s1439_s8 + $0x58] sm:$0xff] }
   0x6   :  { %959 = vmatpush3.bf16.msra.mxu1 %v1044_v3  ;;  %332 = vperm.xlu0 %1040, %v258_v10   ;;  %v1050_v15 = vld [vmem:[%s1438_s7 + $0x20] sm:$0xff]   ;;  %v1051_v18 = vld [vmem:[%s1438_s7 + $0x28] sm:$0xff]   ;;  %v1054_v21 = vld [vmem:[%s1436_s5 + $0x38] sm:$0xff]  }
   0x7   :  { %964 = vmatprep.subr.bf16.mxu1 %v1092_v1  ;;  %322 = vperm.xlu1 %1041, %v256_v11   ;;  %v252_v19 = vld [vmem:[%s1439_s8 + $0x40] sm:$0xff]  ;;  %v253_v20 = vld [vmem:[%s1439_s8 + $0x48] sm:$0xff]  ;;  %v1052_v22 = vld [vmem:[%s1438_s7 + $0x30] sm:$0xff]  }
   0x8   :  { %987 = vmatpush3.bf16.msra.mxu0 %v1045_v4  ;;  %v1055_v23 = vld [vmem:[%s1436_s5 + $0x30] sm:$0xff]   ;;  %v251_v25 = vld [vmem:[%s1439_s8 + $0x38] sm:$0xff]  ;;  %v248_v26 = vld [vmem:[%s1439_s8 + $0x20] sm:$0xff] }
   0x9   :  { %961 = vmatmul.mubr.msk.bf16.vlgmr.msra.gmra.mxu1 %vm64_vm1, %v40_v7  ;;  %v250_v24 = vld [vmem:[%s1439_s8 + $0x30] sm:$0xff]  ;;  %v1053_v27 = vld [vmem:[%s1438_s7 + $0x38] sm:$0xff]   ;;  %v249_v28 = vld [vmem:[%s1439_s8 + $0x28] sm:$0xff] }
   0xa   :  { %980 = vmatprep.mubr.msk.bf16.mxu1 %vm1093_vm0, %v1092_v1  ;;  %337 = vperm.xlu0 %1040, %v259_v12   ;;  %v1056_v29 = vld [vmem:[%s1436_s5 + $0x28] sm:$0xff]   ;;  %v1057_v30 = vld [vmem:[%s1436_s5 + $0x20] sm:$0xff]   ;;  %v246_v31 = vld [vmem:[%s1439_s8 + $0x10] sm:$0xff] }
   0xb   :  { %989 = vmatmul.mubr.msk.bf16.vlgmr.msra.gmra.mxu0 %vm64_vm1, %v1047_v8  ;;  %327 = vperm.xlu1 %1041, %v257_v14   ;;  %v247_v32 = vld [vmem:[%s1439_s8 + $0x18] sm:$0xff] }
   0xc   :  { %992 = vmatprep.mubr.msk.bf16.mxu0 %vm64_vm1, %v1048_v9  ;;  %965 = vmatpush3.bf16.msra.mxu1 %v1054_v21 }
   0xd   :  { %966 = vmatprep.subr.bf16.mxu1 %v1092_v1 }
   0xe   :  { %312 = vperm.xlu0 %1040, %v254_v16  }
   0xf   :  { %317 = vperm.xlu1 %1041, %v255_v17  }
  0x10   :  { %967 = vmatpush3.bf16.msra.mxu1 %v1055_v23 }
  0x11   :  { %968 = vmatprep.subr.bf16.mxu1 %v1092_v1 }
  0x12   :  { %302 = vperm.xlu0 %1040, %v252_v19  }
  0x13   :  { %993 = vmatmul.mubr.msk.bf16.gmra.mxu0 %vm64_vm1, %v1049_v13  ;;  %307 = vperm.xlu1 %1041, %v253_v20  }
  0x14   :  { %996 = vmatprep.mubr.msk.bf16.mxu0 %vm64_vm1, %v1050_v15  ;;  %969 = vmatpush3.bf16.msra.mxu1 %v1056_v29 }
  0x15   :  { %970 = vmatprep.subr.bf16.mxu1 %v1092_v1 }
  0x16   :  { %292 = vperm.xlu0 %1040, %v250_v24  }
  0x17   :  { %297 = vperm.xlu1 %1041, %v251_v25  }
  0x1a   :  { %282 = vperm.xlu0 %1040, %v248_v26  }
  0x1b   :  { %997 = vmatmul.mubr.msk.bf16.gmra.mxu0 %vm64_vm1, %v1051_v18  ;;  %287 = vperm.xlu1 %1041, %v249_v28  }
  0x1c   :  { %1000 = vmatprep.mubr.msk.bf16.mxu0 %vm64_vm1, %v1052_v22 }
  0x23   :  { %1001 = vmatmul.mubr.msk.bf16.gmra.mxu0 %vm64_vm1, %v1053_v27 }
  0x24   :  { %16 = vsyncpa [#allocation3], 0  ;;  %272 = vperm.xlu0 %1040, %v246_v31   ;;  %971 = vmatpush3.bf16.msra.mxu1 %v1057_v30  ;;  %v1058_v33 = vld [vmem:[%s1436_s5 + $0x18] sm:$0xff]   ;;  %v244_v34 = vld [vmem:[%s1439_s8] sm:$0xff]  ;;  %s1095_s25 = smov [#allocation2]  }
  0x25   :  { %277 = vperm.xlu1 %1041, %v247_v32   ;;  %972 = vmatprep.subr.bf16.mxu1 %v1092_v1  ;;  %v245_v35 = vld [vmem:[%s1439_s8 + $0x8] sm:$0xff]  ;;  %v1059_v36 = vld [vmem:[%s1436_s5 + $0x10] sm:$0xff]   ;;  %v553_v37 = vld [vmem:[%s1441_s10] sm:$0xff]  ;;  %s871_s26 = sshll.u32 %s1095_s25, 4  ;;  %s872_s26 = int_to_ptr.vmem [resolvable:$true] %s871_s26 }
  0x26   :  { %v554_v38 = vld [vmem:[%s1441_s10 + $0x8] sm:$0xff]  ;;  %v555_v39 = vld [vmem:[%s1441_s10 + $0x10] sm:$0xff]  ;;  %v556_v40 = vld [vmem:[%s1441_s10 + $0x18] sm:$0xff]  ;;  %s1070_s3 = scalar_lea.vmem %s872_s26, 128  ;;  %p1075_p1 = scmp.lt.s32.totalorder %s872_s26, %s872_s26 }
  0x27   :  { %v557_v41 = vld [vmem:[%s1441_s10 + $0x20] sm:$0xff]  ;;  %v558_v42 = vld [vmem:[%s1441_s10 + $0x28] sm:$0xff]  ;;  %v559_v43 = vld [vmem:[%s1441_s10 + $0x30] sm:$0xff]  ;;  %p1071_p0 = scmp.ne.s32.totalorder %s872_s26, %s1070_s3  ;;  %p1076_p2 = scmp.lt.s32.totalorder %s1070_s3, %s1070_s3 }
  0x28   :  { %262 = vperm.xlu0 %1040, %v244_v34   ;;  %973 = vmatpush3.bf16.msra.mxu1 %v1058_v33  ;;  %v560_v44 = vld [vmem:[%s1441_s10 + $0x38] sm:$0xff]  ;;  %v561_v45 = vld [vmem:[%s1441_s10 + $0x40] sm:$0xff]  ;;  %v562_v46 = vld [vmem:[%s1441_s10 + $0x48] sm:$0xff] }
  0x29   :  { %267 = vperm.xlu1 %1041, %v245_v35   ;;  %974 = vmatprep.subr.bf16.mxu1 %v1092_v1  ;;  %v563_v47 = vld [vmem:[%s1441_s10 + $0x50] sm:$0xff]  ;;  %v564_v48 = vld [vmem:[%s1441_s10 + $0x58] sm:$0xff]  ;;  %v565_v49 = vld [vmem:[%s1441_s10 + $0x60] sm:$0xff]  ;;  %p1077_p3 = por %p1076_p2, %p1075_p1 }
  0x2a   :  { %v566_v50 = vld [vmem:[%s1441_s10 + $0x68] sm:$0xff]  ;;  %v567_v51 = vld [vmem:[%s1441_s10 + $0x70] sm:$0xff]  ;;  %v568_v52 = vld [vmem:[%s1441_s10 + $0x78] sm:$0xff] }
  0x2b   :  { %v1060_v53 = vld [vmem:[%s1436_s5 + $0x8] sm:$0xff]   ;;  %v1061_v54 = vld [vmem:[%s1436_s5] sm:$0xff]   ;;  %p1078_p4 = pnand %p1077_p3, %p1071_p0 }
  0x2c   :  { %571 = vperm.xlu0 %1040, %v553_v37   ;;  %975 = vmatpush3.bf16.msra.mxu1 %v1059_v36  ;;  %v1062_v55 = vld [vmem:[%s1440_s9] sm:$0xff]  }
  0x2d   :  { %576 = vperm.xlu1 %1041, %v554_v38   ;;  %976 = vmatprep.subr.bf16.mxu1 %v1092_v1  ;;  %v879_v56 = vld [vmem:[%s1435_s4] ss:$0 sm:$0xff] }
  0x2e   :  { %1020 = vmatprep.mubr.bf16.mxu0 %v1062_v55 }
  0x30   :  { %581 = vperm.xlu0 %1040, %v555_v39   ;;  %977 = vmatpush3.bf16.msra.mxu1 %v1060_v53 }
  0x31   :  { %586 = vperm.xlu1 %1041, %v556_v40   ;;  %978 = vmatprep.subr.bf16.mxu1 %v1092_v1 }
  0x34   :  { %591 = vperm.xlu0 %1040, %v557_v41   ;;  %979 = vmatpush3.bf16.msra.mxu1 %v1061_v54 }
  0x35   :  { %596 = vperm.xlu1 %1041, %v558_v42  }
  0x38   :  { %601 = vperm.xlu0 %1040, %v559_v43  }
  0x39   :  { %606 = vperm.xlu1 %1041, %v560_v44  }
  0x3c   :  { %611 = vperm.xlu0 %1040, %v561_v45  }
  0x3d   :  { %616 = vperm.xlu1 %1041, %v562_v46  }
  0x40   :  { %621 = vperm.xlu0 %1040, %v563_v47  }
  0x41   :  { %626 = vperm.xlu1 %1041, %v564_v48  }
  0x44   :  { %631 = vperm.xlu0 %1040, %v565_v49  }
  0x45   :  { %636 = vperm.xlu1 %1041, %v566_v50  }
  0x48   :  { %641 = vperm.xlu0 %1040, %v567_v51  }
  0x49   :  { %646 = vperm.xlu1 %1041, %v568_v52  }
  0x81   :  { %v333_v4 = vpop.permute.xlu0 %332 }
  0x82   :  { %v323_v5 = vpop.permute.xlu1 %322 }
  0x85   :  { %v338_v9 = vpop.permute.xlu0 %337 }
  0x86   :  { %v328_v10 = vpop.permute.xlu1 %327 }
  0x89   :  { %v313_v14 = vpop.permute.xlu0 %312 }
  0x8a   :  { %v318_v15 = vpop.permute.xlu1 %317 }
  0x8d   :  { %v303_v19 = vpop.permute.xlu0 %302 }
  0x8e   :  { %v308_v21 = vpop.permute.xlu1 %307 }
  0x91   :  { %v293_v33 = vpop.permute.xlu0 %292 }
  0x92   :  { %v298_v34 = vpop.permute.xlu1 %297 }
  0x95   :  { %v283_v45 = vpop.permute.xlu0 %282 }
  0x96   :  { %v288_v46 = vpop.permute.xlu1 %287 }
  0x9f   :  { %v273_v54 = vpop.permute.xlu0 %272 }
  0xa0   :  { %v278_v55 = vpop.permute.xlu1 %277 }
  0xc9   :  { %v102_v57 = vpop.f32.mrf.mxu1 }
  0xca   :  { %v103_v58 = vadd.f32 %v879_v56, %v102_v57 }
  0xcb   :  { %v1344_v59 = vpop.f32.mrf.mxu0  ;;  %v962_v60 = vpop.f32.mrf.mxu1 }
  0xcc   :  { %v108_v61 = vmax.f32 %v103_v58, 0.0  ;;  %v459_v56 = vadd.f32 %v1344_v59, %v273_v54 }
  0xcd   :  { %v1346_v62 = vpop.f32.mrf.mxu0  ;;  %v105_v63 = vpop.f32.mrf.mxu1 }
  0xce   :  { %v109_v0 = vpack.c.bf16 %v108_v61, %v108_v61  ;;  %v515_v63 = vmax.f32 %v459_v56, 0.0  ;;  %v814_v56 = vld [vmem:[%s1433_s2 + $0x20] sm:$0xff] }
  0xcf   :  { %v1348_v1 = vpop.f32.mrf.mxu0  ;;  %v963_v2 = vpop.f32.mrf.mxu1 }
  0xd0   :  { %981 = vmatmul.mubr.bf16.vlgmr.msra.gmra.mxu1 %v109_v0  ;;  %v462_v61 = vadd.f32 %v1348_v1, %v278_v55  ;;  %v263_v0 = vpop.permute.xlu0 %262  ;;  %v268_v2 = vpop.permute.xlu1 %267  ;;  %v1063_v1 = vld [vmem:[%s1440_s9 + $0x8] sm:$0xff]  }
  0xd1   :  { %v1350_v3 = vpop.f32.mrf.mxu0 }
  0xd3   :  { %v994_v6 = vpop.f32.mrf.mxu0 }
  0xd4   :  { %v475_v47 = vadd.f32 %v994_v6, %v293_v33  ;;  %v451_v6 = vadd.f32 %v1346_v62, %v263_v0  ;;  %v1064_v62 = vld [vmem:[%s1440_s9 + $0x10] sm:$0xff]   ;;  %v815_v0 = vld [vmem:[%s1433_s2 + $0x28] sm:$0xff] }
  0xd5   :  { %v466_v7 = vpop.f32.mrf.mxu0 }
  0xd6   :  { %v519_v50 = vmax.f32 %v475_v47, 0.0  ;;  %v467_v51 = vadd.f32 %v466_v7, %v283_v45  ;;  %v454_v7 = vadd.f32 %v1350_v3, %v268_v2  ;;  %v513_v59 = vmax.f32 %v451_v6, 0.0  ;;  %v1065_v3 = vld [vmem:[%s1440_s9 + $0x18] sm:$0xff]  }
  0xd7   :  { %v995_v8 = vpop.f32.mrf.mxu0 }
  0xd8   :  { %v478_v48 = vadd.f32 %v995_v8, %v298_v34  ;;  %v517_v57 = vmax.f32 %v467_v51, 0.0 }
  0xd9   :  { %v469_v11 = vpop.f32.mrf.mxu0 }
  0xda   :  { %v520_v52 = vmax.f32 %v478_v48, 0.0  ;;  %v470_v53 = vadd.f32 %v469_v11, %v288_v46  ;;  %v1066_v11 = vld [vmem:[%s1440_s9 + $0x20] sm:$0xff]  }
  0xdb   :  { %v998_v12 = vpop.f32.mrf.mxu0 }
  0xdc   :  { %v491_v24 = vadd.f32 %v998_v12, %v313_v14  ;;  %v532_v58 = vpack.c.bf16 %v520_v52, %v519_v50  ;;  %v518_v60 = vmax.f32 %v470_v53, 0.0  ;;  %v1067_v12 = vld [vmem:[%s1440_s9 + $0x28] sm:$0xff]   ;;  %v1069_v14 = vld [vmem:[%s1440_s9 + $0x38] sm:$0xff]  }
  0xdd   :  { %v482_v13 = vpop.f32.mrf.mxu0 }
  0xde   :  { %v523_v35 = vmax.f32 %v491_v24, 0.0  ;;  %v483_v36 = vadd.f32 %v482_v13, %v303_v19  ;;  %v1068_v13 = vld [vmem:[%s1440_s9 + $0x30] sm:$0xff]  }
  0xdf   :  { %v999_v16 = vpop.f32.mrf.mxu0 }
  0xe0   :  { %v494_v26 = vadd.f32 %v999_v16, %v318_v15  ;;  %v521_v42 = vmax.f32 %v483_v36, 0.0  ;;  %v883_v15 = vld [vmem:[%s1437_s6] ss:$0 sm:$0xff] }
  0xe1   :  { %v485_v17 = vpop.f32.mrf.mxu0 }
  0xe2   :  { %v524_v37 = vmax.f32 %v494_v26, 0.0  ;;  %v486_v38 = vadd.f32 %v485_v17, %v308_v21 }
  0xe3   :  { %v1002_v18 = vpop.f32.mrf.mxu0 }
  0xe4   :  { %v507_v20 = vadd.f32 %v1002_v18, %v333_v4  ;;  %v534_v43 = vpack.c.bf16 %v524_v37, %v523_v35  ;;  %v522_v44 = vmax.f32 %v486_v38, 0.0  ;;  %v531_v4 = vpack.c.bf16 %v518_v60, %v517_v57  ;;  %v810_v37 = vld [vmem:[%s1433_s2] sm:$0xff]  ;;  %v811_v38 = vld [vmem:[%s1433_s2 + $0x8] sm:$0xff] }
  0xe5   :  { %v498_v22 = vpop.f32.mrf.mxu0 }
  0xe6   :  { %v499_v23 = vadd.f32 %v498_v22, %v323_v5  ;;  %v527_v27 = vmax.f32 %v507_v20, 0.0  ;;  %v533_v49 = vpack.c.bf16 %v522_v44, %v521_v42  ;;  %v516_v5 = vmax.f32 %v462_v61, 0.0  ;;  %v572_v22 = vpop.permute.xlu0 %571  ;;  %v812_v42 = vld [vmem:[%s1433_s2 + $0x10] sm:$0xff] }
  0xe7   :  { %v1003_v25 = vpop.f32.mrf.mxu0 }
  0xe8   :  { %v510_v28 = vadd.f32 %v1003_v25, %v338_v9  ;;  %v525_v30 = vmax.f32 %v499_v23, 0.0  ;;  %v530_v8 = vpack.c.bf16 %v516_v5, %v515_v63  ;;  %v514_v9 = vmax.f32 %v454_v7, 0.0  ;;  %v577_v23 = vpop.permute.xlu1 %576 }
  0xe9   :  { %v501_v29 = vpop.f32.mrf.mxu0 }
  0xea   :  { %v528_v31 = vmax.f32 %v510_v28, 0.0  ;;  %v502_v32 = vadd.f32 %v501_v29, %v328_v10  ;;  %v529_v10 = vpack.c.bf16 %v514_v9, %v513_v59  ;;  %v582_v24 = vpop.permute.xlu0 %581  ;;  %v816_v59 = vld [vmem:[%s1433_s2 + $0x30] sm:$0xff] }
  0xec   :  { %v536_v39 = vpack.c.bf16 %v528_v31, %v527_v27  ;;  %v526_v40 = vmax.f32 %v502_v32, 0.0  ;;  %v587_v26 = vpop.permute.xlu1 %586 }
  0xee   :  { %v535_v41 = vpack.c.bf16 %v526_v40, %v525_v30  ;;  %1004 = vmatprep.subr.bf16.mxu0 %v536_v39  ;;  %v592_v31 = vpop.permute.xlu0 %591 }
  0xef   :  { %1005 = vmatpush3.bf16.msra.mxu0 %v536_v39 }
  0xf0   :  { %1006 = vmatprep.subr.bf16.mxu0 %v535_v41  ;;  %v597_v36 = vpop.permute.xlu1 %596 }
  0xf2   :  { %v602_v48 = vpop.permute.xlu0 %601 }
  0xf3   :  { %1007 = vmatpush3.bf16.msra.mxu0 %v535_v41 }
  0xf4   :  { %1008 = vmatprep.subr.bf16.mxu0 %v534_v43  ;;  %v607_v55 = vpop.permute.xlu1 %606 }
  0xf7   :  { %1009 = vmatpush3.bf16.msra.mxu0 %v534_v43 }
  0xf8   :  { %1010 = vmatprep.subr.bf16.mxu0 %v533_v49 }
  0xfb   :  { %1011 = vmatpush3.bf16.msra.mxu0 %v533_v49  ;;  %v813_v49 = vld [vmem:[%s1433_s2 + $0x18] sm:$0xff] }
  0xfc   :  { %1012 = vmatprep.subr.bf16.mxu0 %v532_v58 }
  0xff   :  { %1013 = vmatpush3.bf16.msra.mxu0 %v532_v58 }
 0x100   :  { %1014 = vmatprep.subr.bf16.mxu0 %v531_v4 }
 0x103   :  { %1015 = vmatpush3.bf16.msra.mxu0 %v531_v4 }
 0x104   :  { %1016 = vmatprep.subr.bf16.mxu0 %v530_v8 }
 0x107   :  { %1017 = vmatpush3.bf16.msra.mxu0 %v530_v8  ;;  %v612_v8 = vpop.permute.xlu0 %611 }
 0x108   :  { %1018 = vmatprep.subr.bf16.mxu0 %v529_v10 }
 0x10b   :  { %1019 = vmatpush3.bf16.msra.mxu0 %v529_v10 }
 0x10e   :  { %1021 = vmatmul.mubr.bf16.vlgmr.msra.gmra.mxu0 %v1063_v1 }
 0x10f   :  { %1024 = vmatprep.mubr.bf16.mxu0 %v1064_v62 }
 0x116   :  { %1025 = vmatmul.mubr.bf16.gmra.mxu0 %v1065_v3 }
 0x117   :  { %1028 = vmatprep.mubr.bf16.mxu0 %v1066_v11  ;;  %v817_v11 = vld [vmem:[%s1433_s2 + $0x38] sm:$0xff] }
 0x11e   :  { %1029 = vmatmul.mubr.bf16.gmra.mxu0 %v1067_v12 }
 0x11f   :  { %1032 = vmatprep.mubr.bf16.mxu0 %v1068_v13 }
 0x126   :  { %1033 = vmatmul.mubr.bf16.gmra.mxu0 %v1069_v14 }
 0x190   :  { %v215_v16 = vpop.f32.mrf.mxu1 }
 0x191   :  { %v216_v17 = vadd.f32 %v883_v15, %v215_v16  ;;  %v617_v16 = vpop.permute.xlu1 %616 }
 0x192   :  { %v982_v18 = vpop.f32.mrf.mxu1 }
 0x193   :  { %v221_v19 = vand.u32 2147483647, %v216_v17  ;;  %v818_v17 = vld [vmem:[%s1433_s2 + $0x40] sm:$0xff] }
 0x194   :  { %v218_v20 = vpop.f32.mrf.mxu1 }
 0x195   :  { %222 = vadd.xlane.f32.xlu0 %v221_v19 }
 0x196   :  { %v983_v21 = vpop.f32.mrf.mxu1 }
 0x1ce   :  { %v1022_v25 = vpop.f32.mrf.mxu0 }
 0x1cf   :  { %v740_v30 = vadd.f32 %v1022_v25, %v582_v24 }
 0x1d0   :  { %v731_v27 = vpop.f32.mrf.mxu0 }
 0x1d1   :  { %v732_v28 = vadd.f32 %v731_v27, %v572_v22  ;;  %v796_v40 = vand.u32 2147483647, %v740_v30  ;;  %v622_v22 = vpop.permute.xlu0 %621 }
 0x1d2   :  { %v1023_v29 = vpop.f32.mrf.mxu0 }
 0x1d3   :  { %v794_v33 = vand.u32 2147483647, %v732_v28  ;;  %v743_v34 = vadd.f32 %v1023_v29, %v587_v26  ;;  %v828_v51 = vmul.f32 %v812_v42, %v796_v40 }
 0x1d4   :  { %v734_v32 = vpop.f32.mrf.mxu0 }
 0x1d5   :  { %v735_v35 = vadd.f32 %v734_v32, %v577_v23  ;;  %v826_v44 = vmul.f32 %v810_v37, %v794_v33  ;;  %v797_v45 = vand.u32 2147483647, %v743_v34  ;;  %v819_v23 = vld [vmem:[%s1433_s2 + $0x48] sm:$0xff]  ;;  %v627_v32 = vpop.permute.xlu1 %626 }
 0x1d6   :  { %v1026_v39 = vpop.f32.mrf.mxu0 }
 0x1d7   :  { %v795_v41 = vand.u32 2147483647, %v735_v35  ;;  %v756_v53 = vadd.f32 %v1026_v39, %v602_v48  ;;  %v829_v58 = vmul.f32 %v813_v49, %v797_v45  ;;  %v822_v49 = vld [vmem:[%s1433_s2 + $0x60] sm:$0xff] }
 0x1d8   :  { %v747_v43 = vpop.f32.mrf.mxu0 }
 0x1d9   :  { %v827_v46 = vmul.f32 %v811_v38, %v795_v41  ;;  %v748_v47 = vadd.f32 %v747_v43, %v592_v31  ;;  %v800_v4 = vand.u32 2147483647, %v756_v53  ;;  %v632_v38 = vpop.permute.xlu0 %631  ;;  %v637_v43 = vpop.permute.xlu1 %636  ;;  %v823_v53 = vld [vmem:[%s1433_s2 + $0x68] sm:$0xff] }
 0x1da   :  { %v1027_v50 = vpop.f32.mrf.mxu0 }
 0x1db   :  { %v842_v52 = vadd.f32 %v827_v46, %v826_v44  ;;  %v798_v54 = vand.u32 2147483647, %v748_v47  ;;  %v759_v61 = vadd.f32 %v1027_v50, %v607_v55  ;;  %v832_v13 = vmul.f32 %v816_v59, %v800_v4  ;;  %v821_v44 = vld [vmem:[%s1433_s2 + $0x58] sm:$0xff] }
 0x1dc   :  { %v750_v57 = vpop.f32.mrf.mxu0 }
 0x1dd   :  { %v843_v60 = vadd.f32 %v842_v52, %v828_v51  ;;  %v751_v63 = vadd.f32 %v750_v57, %v597_v36  ;;  %v830_v5 = vmul.f32 %v814_v56, %v798_v54  ;;  %v801_v1 = vand.u32 2147483647, %v759_v61  ;;  %v820_v36 = vld [vmem:[%s1433_s2 + $0x50] sm:$0xff]  ;;  %v642_v52 = vpop.permute.xlu0 %641 }
 0x1de   :  { %v1030_v2 = vpop.f32.mrf.mxu0 }
 0x1df   :  { %v844_v6 = vadd.f32 %v843_v60, %v829_v58  ;;  %v799_v7 = vand.u32 2147483647, %v751_v63  ;;  %v833_v19 = vmul.f32 %v817_v11, %v801_v1  ;;  %v772_v25 = vadd.f32 %v1030_v2, %v622_v22  ;;  %v647_v58 = vpop.permute.xlu1 %646  ;;  %v824_v63 = vld [vmem:[%s1433_s2 + $0x70] sm:$0xff] }
 0x1e0   :  { %v763_v9 = vpop.f32.mrf.mxu0 }
 0x1e1   :  { %v845_v10 = vadd.f32 %v844_v6, %v830_v5  ;;  %v831_v62 = vmul.f32 %v815_v0, %v799_v7  ;;  %v764_v3 = vadd.f32 %v763_v9, %v612_v8  ;;  %v804_v34 = vand.u32 2147483647, %v772_v25  ;;  %v825_v5 = vld [vmem:[%s1433_s2 + $0x78] sm:$0xff] }
 0x1e2   :  { %v1031_v12 = vpop.f32.mrf.mxu0 }
 0x1e3   :  { %v846_v14 = vadd.f32 %v845_v10, %v831_v62  ;;  %v802_v15 = vand.u32 2147483647, %v764_v3  ;;  %v775_v35 = vadd.f32 %v1031_v12, %v627_v32  ;;  %v836_v40 = vmul.f32 %v820_v36, %v804_v34 }
 0x1e4   :  { %v766_v18 = vpop.f32.mrf.mxu0 }
 0x1e5   :  { %v847_v20 = vadd.f32 %v846_v14, %v832_v13  ;;  %v767_v21 = vadd.f32 %v766_v18, %v617_v16  ;;  %v834_v26 = vmul.f32 %v818_v17, %v802_v15  ;;  %v805_v41 = vand.u32 2147483647, %v775_v35 }
 0x1e6   :  { %v1034_v24 = vpop.f32.mrf.mxu0 }
 0x1e7   :  { %v848_v27 = vadd.f32 %v847_v20, %v833_v19  ;;  %v803_v28 = vand.u32 2147483647, %v767_v21  ;;  %v837_v47 = vmul.f32 %v821_v44, %v805_v41  ;;  %v788_v54 = vadd.f32 %v1034_v24, %v642_v52 }
 0x1e8   :  { %v779_v29 = vpop.f32.mrf.mxu0 }
 0x1e9   :  { %v849_v30 = vadd.f32 %v848_v27, %v834_v26  ;;  %v835_v31 = vmul.f32 %v819_v23, %v803_v28  ;;  %v780_v42 = vadd.f32 %v779_v29, %v632_v38  ;;  %v808_v60 = vand.u32 2147483647, %v788_v54 }
 0x1ea   :  { %v1035_v33 = vpop.f32.mrf.mxu0 }
 0x1eb   :  { %v850_v37 = vadd.f32 %v849_v30, %v835_v31  ;;  %v806_v48 = vand.u32 2147483647, %v780_v42  ;;  %v791_v61 = vadd.f32 %v1035_v33, %v647_v58  ;;  %v840_v2 = vmul.f32 %v824_v63, %v808_v60 }
 0x1ec   :  { %v782_v39 = vpop.f32.mrf.mxu0 }
 0x1ed   :  { %v851_v45 = vadd.f32 %v850_v37, %v836_v40  ;;  %v783_v46 = vadd.f32 %v782_v39, %v637_v43  ;;  %v838_v55 = vmul.f32 %v822_v49, %v806_v48  ;;  %v809_v4 = vand.u32 2147483647, %v791_v61 }
 0x1ef   :  { %v852_v50 = vadd.f32 %v851_v45, %v837_v47  ;;  %v807_v51 = vand.u32 2147483647, %v783_v46  ;;  %v841_v7 = vmul.f32 %v825_v5, %v809_v4 }
 0x1f1   :  { %v853_v56 = vadd.f32 %v852_v50, %v838_v55  ;;  %v839_v57 = vmul.f32 %v823_v53, %v807_v51 }
 0x1f3   :  { %v854_v0 = vadd.f32 %v853_v56, %v839_v57 }
 0x1f5   :  { %v855_v6 = vadd.f32 %v854_v0, %v840_v2 }
 0x1f7   :  { %v856_v8 = vadd.f32 %v855_v6, %v841_v7 }
 0x1f9   :  { %v857_v59 = vrot.slane %v856_v8, 4 }
 0x1fb   :  { %v858_v9 = vadd.f32 %v857_v59, %v856_v8 }
 0x1fd   :  { %v859_v10 = vrot.slane %v858_v9, 2 }
 0x1ff   :  { %v860_v1 = vadd.f32 %v859_v10, %v858_v9 }
 0x201   :  { %v861_v62 = vrot.slane %v860_v1, 1 }
 0x203   :  { %v862_v3 = vadd.f32 %v861_v62, %v860_v1 }
 0x21e   :  { %v223_v11 = vpop.xlane.xlu0 %222 }
 0x21f   :  { %v863_v12 = vadd.f32 %v862_v3, %v223_v11 }
 0x221   :  { %864 = vst [vmem:[#allocation2] sm:$0xff] %v863_v12 }
 0x222   :  { %1081 = shalt.err (!%p1078_p4)
}
 0x223   :  { %874 = dma.vmem_to_hbm [thread:$0]  %s872_s26, 128, %s1442_s11, [#allocation3]  }
 0x224   :  { %1090 = dma.done.wait [#allocation3], 128  }
 0x225   :  { %1091 = vsyncadd [#allocation3], 4294967168 }
 0x226   :  { %878 = vsyncpa [#allocation3], 1 }

</bundles_post_ra>
